<compile_context>
chip_gen: v7x
topology: tpu7x:2x2x1
jax: 0.10.0
libtpu: 0.0.40
codegen_flags: <defaults>
</compile_context>

<pallas_src>
import functools

import jax
import jax.numpy as jnp
from jax.experimental import pallas as pl
from jax.experimental.pallas import tpu as pltpu


def _round_up(x, m):
    return (x + m - 1) // m * m


def _estimator_kernel(c_ref, a_ref, w1t_ref, w2ht_ref, tail_ref, o_ref, *, H1, H2):
    # Resident pack of the tiny operands: col0=b1, col1=w2_action, col2=b2,
    # col3=w3 (rows 0..H2-1) and b3 (row H2).
    tail = tail_ref[...]                     # (R, 4)
    b1 = tail[0:H1, 0:1]                     # (H1, 1)
    w2a = tail[0:H2, 1:2]                    # (H2, 1)
    b2 = tail[0:H2, 2:3]                     # (H2, 1)
    w3 = tail[0:H2, 3:4]                     # (H2, 1)
    b3 = tail[H2:H2 + 1, 3:4]                # (1, 1)

    # fc1 + sigmoid, with the batch on the lane axis:
    #   (H1, tb) = w1^T (H1, L) . classifier (tb, L)^T
    # (rhs contracted on its last dim — same pattern as flash-attention QK^T).
    h1 = jax.nn.sigmoid(
        jax.lax.dot_general(
            w1t_ref[...], c_ref[...],
            dimension_numbers=(((1,), (1,)), ((), ())),
            preferred_element_type=jnp.float32)
        + b1)

    # fc2 over concat(h1, action) + sigmoid, split-matmul form of the concat.
    # The action row is already lane-dense (1, tb): its contribution is a pure
    # VPU outer product (H2,1)*(1,tb) — no relayout, no K=1 MXU matmul.
    a_row = a_ref[0]                          # (1, tb)
    h2 = jax.nn.sigmoid(
        jnp.dot(w2ht_ref[...], h1, preferred_element_type=jnp.float32)
        + w2a * a_row
        + b2)

    # fc3 (5 -> 1): VPU multiply + sublane reduce. The result is already the
    # lane-dense (1, tb) output row — dense vector stores, no masked vst.msk.
    o_ref[0] = jnp.sum(h2 * w3, axis=0, keepdims=True) + b3


def _choose_tile(B, L, H1, H2, block_batch, stream_budget):
    """Pick the batch tile from the *real* (lane-padded) VMEM footprint."""
    lane_L = _round_up(L, 128)
    bytes_per_row = (
        2 * 4 * lane_L                         # classifier (tb,L) blocks, double-buffered, lane-padded
        + 2 * 8 * 4                            # action (1,1,tb) blocks (1 sublane pads to 8), x2 buffers
        + 2 * 8 * 4                            # output (1,1,tb) blocks, x2 buffers
        + 4 * (_round_up(H1, 8) + _round_up(H2, 8))  # (H1,tb)/(H2,tb) transposed intermediates
        + 4 * L                                # fc1 transposed-operand staging
    )
    max_tb = max(8, (stream_budget // bytes_per_row) // 8 * 8)
    tb = min(block_batch, max_tb)
    # Keep >= 4 grid steps for large batches (2 pipelined steps per v7x core),
    # but never shrink the tile below 1024 rows just for that.
    if B >= 4 * 1024:
        quarter = _round_up((B + 3) // 4, 8)
        tb = min(tb, max(1024, quarter))
    tb = min(tb, _round_up(B, 8))
    tb = max(8, (tb // 8) * 8)
    if tb >= 128:
        tb = (tb // 128) * 128                 # lane-aligned (1, tb) rows / DMAs
    return tb


def estimator_forward(classifier_input, action_input, params, *, block_batch=8192):
    """classifier_input: (B, L) f32, action_input: (B, 1) f32 -> (B, 1) f32."""
    B, L = classifier_input.shape
    w1, b1, w2, b2, w3, b3 = (params["w1"], params["b1"], params["w2"],
                              params["b2"], params["w3"], params["b3"])
    H1 = w1.shape[1]              # fc1 hidden width (10) — derived, not hardcoded
    H2 = w2.shape[1]              # fc2 hidden width (5)
    assert w2.shape[0] == H1 + 1

    # Per-generation VMEM sizing: v5e/v6e have 128 MiB physical (raise the
    # 16/32 MiB scoped default), v7x only 64 MiB per core (cap at ~48 MiB).
    try:
        vmem_cap = int(pltpu.get_tpu_info().vmem_capacity_bytes)
    except Exception:
        vmem_cap = 64 * 1024 * 1024
    vmem_limit = min(96 * 1024 * 1024, (vmem_cap * 3) // 4)
    stream_budget = (vmem_limit * 3) // 4      # headroom for weights + compiler scratch

    tb = _choose_tile(B, L, H1, H2, block_batch, stream_budget)
    Bp = _round_up(B, tb)
    G = Bp // tb

    if Bp != B:
        pad = Bp - B
        classifier_input = jnp.pad(classifier_input, ((0, pad), (0, 0)))
        action_input = jnp.pad(action_input, ((0, pad), (0, 0)))
    # Lane-dense view of the action stream: (Bp,1) -> (G,1,tb) is a free
    # reshape of contiguous memory; each (1,1,tb) block is a dense row.
    action_rows = action_input.reshape(G, 1, tb)

    # Transposed weights — compute keeps the batch on the lane axis.
    w1t = w1.T                                  # (H1, L)
    w2ht = w2[:H1, :].T                         # (H2, H1)
    # Pack the five tiny vectors into one resident array (5 inputs, not 9).
    R = max(H1, H2 + 1)
    tail = jnp.zeros((R, 4), jnp.float32)
    tail = tail.at[:H1, 0].set(b1)
    tail = tail.at[:H2, 1].set(w2[H1:, :].reshape(H2))   # fc2 action row -> column
    tail = tail.at[:H2, 2].set(b2)
    tail = tail.at[:H2, 3].set(w3.reshape(H2))
    tail = tail.at[H2, 3].set(b3[0])

    cost = pl.CostEstimate(
        flops=int(2 * Bp * (L * H1 + (H1 + 1) * H2 + H2)),
        transcendentals=int(Bp * (H1 + H2)),
        bytes_accessed=int(4 * (Bp * L + 2 * Bp + H1 * L + H2 * H1 + R * 4)),
    )

    out = pl.pallas_call(
        functools.partial(_estimator_kernel, H1=H1, H2=H2),
        out_shape=jax.ShapeDtypeStruct((G, 1, tb), jnp.float32),
        grid=(G,),
        in_specs=[
            # TODO(synk): optionally stream classifier_input as bf16 (halves the
            # dominant HBM term) once precision is signed off; keep f32 accum.
            pl.BlockSpec((tb, L), lambda i: (i, 0)),        # classifier stream
            pl.BlockSpec((1, 1, tb), lambda i: (i, 0, 0)),  # action stream (lane-dense)
            pl.BlockSpec((H1, L), lambda i: (0, 0)),        # w1^T (resident)
            pl.BlockSpec((H2, H1), lambda i: (0, 0)),       # w2_hidden^T (resident)
            pl.BlockSpec((R, 4), lambda i: (0, 0)),         # packed b1/w2a/b2/w3/b3
        ],
        out_specs=pl.BlockSpec((1, 1, tb), lambda i: (i, 0, 0)),
        compiler_params=pltpu.CompilerParams(
            dimension_semantics=("parallel",),
            vmem_limit_bytes=int(vmem_limit)),
        cost_estimate=cost,
    )(classifier_input, action_rows, w1t, w2ht, tail)

    out = out.reshape(Bp, 1)
    if Bp != B:
        out = out[:B]
    return out


def init_params(key, classifier_state_length, bias_average=0.5):
    """Deterministic synthetic parameters matching the PyTorch module shapes."""
    k1, k2, k3, k4, k5 = jax.random.split(key, 5)
    params = {
        # fc1: Linear(L, 10)   -> stored (L, 10)
        "w1": jax.random.normal(k1, (classifier_state_length, 10), jnp.float32) * 0.1,
        "b1": jax.random.normal(k2, (10,), jnp.float32) * 0.1,
        # fc2: Linear(10+1, 5) -> stored (11, 5)
        "w2": jax.random.normal(k3, (11, 5), jnp.float32) * 0.1,
        "b2": jax.random.normal(k4, (5,), jnp.float32) * 0.1,
        # fc3: Linear(5, 1)    -> stored (5, 1); bias set to bias_average
        "w3": jax.random.normal(k5, (5, 1), jnp.float32) * 0.1,
        "b3": jnp.full((1,), bias_average, jnp.float32),
    }
    return params


def reference_forward(classifier_input, action_input, params):
    x = jax.nn.sigmoid(classifier_input @ params["w1"] + params["b1"])
    x = jnp.concatenate([x, action_input], axis=1)
    x = jax.nn.sigmoid(x @ params["w2"] + params["b2"])
    return x @ params["w3"] + params["b3"]


if __name__ == "__main__":
    L = 32                   # classifier_state_length
    key = jax.random.PRNGKey(0)
    k_c, k_a, k_p = jax.random.split(key, 3)
    params = init_params(k_p, L, bias_average=0.5)

    # Case 1: tiny tile-aligned batch (single grid step).
    B = 8
    classifier_input = jax.random.normal(k_c, (B, L), jnp.float32)
    action_input = jax.random.uniform(k_a, (B, 1), jnp.float32)
    out = jax.block_until_ready(
        estimator_forward(classifier_input, action_input, params))
    ref = reference_forward(classifier_input, action_input, params)
    assert out.shape == (B, 1)
    assert jnp.allclose(out, ref, atol=1e-5, rtol=1e-5)

    # Case 2: batch not a tile multiple, small forced tile -> multi-step grid
    # (exercises padding, lane-dense action/output streams, pipelining).
    B2 = 300
    c2 = jax.random.normal(jax.random.PRNGKey(1), (B2, L), jnp.float32)
    a2 = jax.random.uniform(jax.random.PRNGKey(2), (B2, 1), jnp.float32)
    out2 = jax.block_until_ready(
        estimator_forward(c2, a2, params, block_batch=128))
    ref2 = reference_forward(c2, a2, params)
    assert out2.shape == (B2, 1)
    assert jnp.allclose(out2, ref2, atol=1e-5, rtol=1e-5)

    # Case 3: default block_batch path with a non-aligned batch (tile rounds
    # down to a 128-multiple, batch padded up to the tile).
    B3 = 1000
    c3 = jax.random.normal(jax.random.PRNGKey(3), (B3, L), jnp.float32)
    a3 = jax.random.uniform(jax.random.PRNGKey(4), (B3, 1), jnp.float32)
    out3 = jax.block_until_ready(estimator_forward(c3, a3, params))
    ref3 = reference_forward(c3, a3, params)
    assert out3.shape == (B3, 1)
    assert jnp.allclose(out3, ref3, atol=1e-5, rtol=1e-5)

    print("KERNEL_OK")
</pallas_src>

<mosaic_0001>
module attributes {stable_mosaic.version = 11 : i64} {
  func.func @_estimator_kernel(%arg0: i32, %arg1: memref<8x32xf32, #tpu.memory_space<vmem>>, %arg2: memref<1x1x8xf32, #tpu.memory_space<vmem>>, %arg3: memref<10x32xf32, #tpu.memory_space<vmem>>, %arg4: memref<5x10xf32, #tpu.memory_space<vmem>>, %arg5: memref<10x4xf32, #tpu.memory_space<vmem>>, %arg6: memref<1x1x8xf32, #tpu.memory_space<vmem>>) attributes {dimension_semantics = [#tpu.dimension_semantics<parallel>], iteration_bounds = array<i64: 1>, scalar_prefetch = 0 : i64, scratch_operands = 0 : i64, tpu.core_type = #tpu.core_type<tc>, window_params = [{transform_indices = @transform_0, window_bounds = array<i64: 8, 32>}, {transform_indices = @transform_1, window_bounds = array<i64: 1, 1, 8>}, {pipeline_mode = #tpu.pipeline_mode<synchronous>, transform_indices = @transform_2, window_bounds = array<i64: 10, 32>}, {pipeline_mode = #tpu.pipeline_mode<synchronous>, transform_indices = @transform_3, window_bounds = array<i64: 5, 10>}, {pipeline_mode = #tpu.pipeline_mode<synchronous>, transform_indices = @transform_4, window_bounds = array<i64: 10, 4>}, {transform_indices = @transform_5, window_bounds = array<i64: 1, 1, 8>}]} {
    %c0 = arith.constant 0 : index
    %c0_0 = arith.constant 0 : index
    %0 = vector.load %arg5[%c0, %c0_0] : memref<10x4xf32, #tpu.memory_space<vmem>>, vector<10x4xf32>
    %1 = vector.extract_strided_slice %0 {offsets = [0, 0], sizes = [10, 1], strides = [1, 1]} : vector<10x4xf32> to vector<10x1xf32>
    %2 = vector.extract_strided_slice %0 {offsets = [0, 1], sizes = [5, 1], strides = [1, 1]} : vector<10x4xf32> to vector<5x1xf32>
    %3 = vector.extract_strided_slice %0 {offsets = [0, 2], sizes = [5, 1], strides = [1, 1]} : vector<10x4xf32> to vector<5x1xf32>
    %4 = vector.extract_strided_slice %0 {offsets = [0, 3], sizes = [5, 1], strides = [1, 1]} : vector<10x4xf32> to vector<5x1xf32>
    %5 = vector.extract_strided_slice %0 {offsets = [5, 3], sizes = [1, 1], strides = [1, 1]} : vector<10x4xf32> to vector<1x1xf32>
    %c0_1 = arith.constant 0 : index
    %c0_2 = arith.constant 0 : index
    %6 = vector.load %arg3[%c0_1, %c0_2] : memref<10x32xf32, #tpu.memory_space<vmem>>, vector<10x32xf32>
    %c0_3 = arith.constant 0 : index
    %c0_4 = arith.constant 0 : index
    %7 = vector.load %arg1[%c0_3, %c0_4] : memref<8x32xf32, #tpu.memory_space<vmem>>, vector<8x32xf32>
    %cst = arith.constant dense<0.000000e+00> : vector<10x8xf32>
    %8 = tpu.matmul %6, %7, %cst {dimension_numbers = #tpu.dot_dimension_numbers<[1], [1], [0], [0], [0, 0, 1, 0], [], []>} : vector<10x32xf32>, vector<8x32xf32>, vector<10x8xf32> -> vector<10x8xf32>
    %9 = vector.broadcast %1 : vector<10x1xf32> to vector<10x8xf32>
    %10 = arith.addf %8, %9 : vector<10x8xf32>
    %11 = arith.negf %10 : vector<10x8xf32>
    %12 = math.exp %11 : vector<10x8xf32>
    %cst_5 = arith.constant 1.000000e+00 : f32
    %13 = vector.broadcast %cst_5 : f32 to vector<10x8xf32>
    %14 = arith.addf %13, %12 : vector<10x8xf32>
    %15 = arith.divf %13, %14 : vector<10x8xf32>
    %c0_6 = arith.constant 0 : index
    %c0_7 = arith.constant 0 : index
    %c0_8 = arith.constant 0 : index
    %16 = vector.load %arg2[%c0_6, %c0_7, %c0_8] : memref<1x1x8xf32, #tpu.memory_space<vmem>>, vector<1x1x8xf32>
    %17 = vector.shape_cast %16 : vector<1x1x8xf32> to vector<1x8xf32>
    %c0_9 = arith.constant 0 : index
    %c0_10 = arith.constant 0 : index
    %18 = vector.load %arg4[%c0_9, %c0_10] : memref<5x10xf32, #tpu.memory_space<vmem>>, vector<5x10xf32>
    %cst_11 = arith.constant dense<0.000000e+00> : vector<5x8xf32>
    %19 = tpu.matmul %18, %15, %cst_11 {dimension_numbers = #tpu.dot_dimension_numbers<[1], [0], [0], [1], [0, 0, 1, 1], [], []>} : vector<5x10xf32>, vector<10x8xf32>, vector<5x8xf32> -> vector<5x8xf32>
    %20 = vector.broadcast %2 : vector<5x1xf32> to vector<5x8xf32>
    %21 = vector.broadcast %17 : vector<1x8xf32> to vector<5x8xf32>
    %22 = arith.mulf %20, %21 : vector<5x8xf32>
    %23 = arith.addf %19, %22 : vector<5x8xf32>
    %24 = vector.broadcast %3 : vector<5x1xf32> to vector<5x8xf32>
    %25 = arith.addf %23, %24 : vector<5x8xf32>
    %26 = arith.negf %25 : vector<5x8xf32>
    %27 = math.exp %26 : vector<5x8xf32>
    %cst_12 = arith.constant 1.000000e+00 : f32
    %28 = vector.broadcast %cst_12 : f32 to vector<5x8xf32>
    %29 = arith.addf %28, %27 : vector<5x8xf32>
    %30 = arith.divf %28, %29 : vector<5x8xf32>
    %31 = vector.broadcast %4 : vector<5x1xf32> to vector<5x8xf32>
    %32 = arith.mulf %30, %31 : vector<5x8xf32>
    %cst_13 = arith.constant dense<0.000000e+00> : vector<8xf32>
    %33 = vector.multi_reduction <add>, %32, %cst_13 [0] : vector<5x8xf32> to vector<8xf32>
    %34 = vector.shape_cast %33 : vector<8xf32> to vector<1x8xf32>
    %35 = vector.broadcast %5 : vector<1x1xf32> to vector<1x8xf32>
    %36 = arith.addf %34, %35 : vector<1x8xf32>
    %c0_14 = arith.constant 0 : index
    %c0_15 = arith.constant 0 : index
    %c0_16 = arith.constant 0 : index
    %37 = vector.load %arg6[%c0_14, %c0_15, %c0_16] : memref<1x1x8xf32, #tpu.memory_space<vmem>>, vector<1x1x8xf32>
    %38 = vector.shape_cast %37 : vector<1x1x8xf32> to vector<1x8xf32>
    %39 = vector.shape_cast %36 : vector<1x8xf32> to vector<1x1x8xf32>
    tpu.vector_store %arg6[%c0_14, %c0_15, %c0_16], %39 {strides = array<i32>} : memref<1x1x8xf32, #tpu.memory_space<vmem>>, vector<1x1x8xf32>,
    return
  }
  func.func @transform_0(%arg0: i32) -> (i32, i32) {
    %c0_i32 = arith.constant 0 : i32
    %c0_i32_0 = arith.constant 0 : i32
    return %arg0, %c0_i32 : i32, i32
  }
  func.func @transform_1(%arg0: i32) -> (i32, i32, i32) {
    %c0_i32 = arith.constant 0 : i32
    %c0_i32_0 = arith.constant 0 : i32
    %c0_i32_1 = arith.constant 0 : i32
    return %arg0, %c0_i32, %c0_i32_0 : i32, i32, i32
  }
  func.func @transform_2(%arg0: i32) -> (i32, i32) {
    %c0_i32 = arith.constant 0 : i32
    %c0_i32_0 = arith.constant 0 : i32
    %c0_i32_1 = arith.constant 0 : i32
    return %c0_i32, %c0_i32_0 : i32, i32
  }
  func.func @transform_3(%arg0: i32) -> (i32, i32) {
    %c0_i32 = arith.constant 0 : i32
    %c0_i32_0 = arith.constant 0 : i32
    %c0_i32_1 = arith.constant 0 : i32
    return %c0_i32, %c0_i32_0 : i32, i32
  }
  func.func @transform_4(%arg0: i32) -> (i32, i32) {
    %c0_i32 = arith.constant 0 : i32
    %c0_i32_0 = arith.constant 0 : i32
    %c0_i32_1 = arith.constant 0 : i32
    return %c0_i32, %c0_i32_0 : i32, i32
  }
  func.func @transform_5(%arg0: i32) -> (i32, i32, i32) {
    %c0_i32 = arith.constant 0 : i32
    %c0_i32_0 = arith.constant 0 : i32
    %c0_i32_1 = arith.constant 0 : i32
    return %arg0, %c0_i32, %c0_i32_0 : i32, i32, i32
  }
}

</mosaic_0001>

<bundles_post_ra>
// kernel: tpu_custom_call.1
= control target key start
LH: loop header
LB: loop body
LE: loop exit
PB: predicated region body
PF: predicated region fallthrough
CT: control target
= control target key end

     0   :  { %10 = vsyncpa [#allocation3], 0  ;;  %s465_s0 = inlined_call_operand.vmem [shape: f32[8,32], index: 0, kind: input, shape index: {}]   ;;  %s466_s1 = inlined_call_operand.vmem [shape: f32[1,1,8], index: 1, kind: input, shape index: {}]   ;;  %s467_s2 = inlined_call_operand.vmem [shape: f32[10,32], index: 2, kind: input, shape index: {}]   ;;  %s468_s3 = inlined_call_operand.hbm [shape: f32[5,10], index: 3, kind: input, shape index: {}]   ;;  %s469_s4 = inlined_call_operand.vmem [shape: f32[10,4], index: 4, kind: input, shape index: {}]   ;;  %s470_s5 = inlined_call_operand.hbm [shape: f32[1,1,8], index: 5, kind: output, shape index: {}]  }
   0x1   :  { %11 = vsyncpa [#allocation4], 0  ;;  %s383_s18 = smov [#allocation2]   ;;  %s335_s22 = scalar_lea.hbm %s468_s3, 128 }
   0x2   :  { %s24_s19 = sshll.u32 %s383_s18, 4  ;;  %p336_p0 = scmp.ne.s32.totalorder %s468_s3, %s335_s22  ;;  %s25_s19 = int_to_ptr.vmem [resolvable:$true] %s24_s19 }
   0x3   :  { %p339_p1 = scmp.lt.u32.totalorder %s335_s22, %s468_s3 }
   0x5   :  { %p341_p2 = pnand %p339_p1, %p336_p0 }
   0x7   :  { %344 = shalt.err (!%p341_p2)
}
   0x8   :  { %s345_s27 = scalar_lea.vmem %s25_s19, 128  ;;  %p350_p4 = scmp.lt.s32.totalorder %s25_s19, %s25_s19 }
   0x9   :  { %p346_p3 = scmp.ne.s32.totalorder %s25_s19, %s345_s27  ;;  %p351_p5 = scmp.lt.s32.totalorder %s345_s27, %s345_s27 }
   0xb   :  { %p352_p6 = por %p351_p5, %p350_p4 }
   0xd   :  { %p353_p7 = pnand %p352_p6, %p346_p3 }
   0xf   :  { %356 = shalt.err (!%p353_p7)
}
  0x10   :  { %27 = dma.hbm_to_vmem [thread:$0]  %s468_s3, 128, %s25_s19, [#allocation3]  }
  0x11   :  { %379 = dma.done.wait [#allocation3], 128  }
  0x12   :  { %380 = vsyncadd [#allocation3], 4294967168  ;;  %v384_v0 = vmov 0   ;;  %vm48_vm0 = vcmask 261120   ;;  %v37_v1 = vld [vmem:[%s465_s0] sm:$0xff]  ;;  %v385_v6 = vmov 0.0|0.0  }
  0x13   :  { %319 = vset.pattern.permute.xlu0 %v384_v0  ;;  %v35_v2 = vld [vmem:[%s467_s2] sm:$0xff]  ;;  %293 = vmatprep.subr.msk.mxu0 %vm48_vm0, %v37_v1  ;;  %v36_v4 = vld [vmem:[%s467_s2 + $0x8] sm:$0x3]  ;;  %vm386_vm1 = vmmov 0   ;;  %v387_v7 = vmov 0.0   ;;  %v388_v8 = vmov 1  }
  0x14   :  { %295 = vmatprep.mubr.msk.f32.mxu0 %vm48_vm0, %v35_v2  ;;  %v33_v3 = vld [vmem:[%s469_s4] sm:$0xff]  ;;  %294 = vmatpush3.xpose.msk.msra.mxu0 %vm48_vm0, %v37_v1  ;;  %v34_v5 = vld [vmem:[%s469_s4 + $0x8] sm:$0x3]  ;;  %v389_v9 = vmov 3   ;;  %v390_v10 = vmov 2   ;;  %vm162_vm2 = vcmask 1041408  }
  0x15   :  { %40 = vperm.xlu0 %319, %v33_v3   ;;  %305 = vmatprep.subr.bf16.mxu1 %v385_v6  ;;  %vm391_vm3 = vmmov 1   ;;  %v146_v26 = vld [vmem:[#allocation2] sm:$0x1f]  ;;  %vm158_vm5 = vcmask 80896   ;;  %vm252_vm6 = vcmask 61440   ;;  %vm261_vm7 = vcmask 62469  }
  0x16   :  { %302 = vmatprep.mubr.msk.f32.mxu1 %vm386_vm1, %v387_v7  ;;  %320 = vset.pattern.permute.xlu1 %v388_v8  ;;  %vm307_vm4 = vmpackc.low %vm162_vm2, %vm391_vm3  ;;  %v283_v27 = vld [vmem:[%s466_s1] ss:$0 sm:$0xff]  ;;  %s392_s1 = smov [#allocation5]  }
  0x17   :  { %296 = vmatmul.mubr.msk.f32.vlgmr.msra.gmra.mrb[0].mxu0 %vm48_vm0, %v36_v4  ;;  %148 = vperm.xlu1 %320, %v33_v3   ;;  %s269_s4 = sshll.u32 %s392_s1, 4  ;;  %s270_s4 = int_to_ptr.vmem [resolvable:$true] %s269_s4 }
  0x18   :  { %s357_s14 = scalar_lea.vmem %s270_s4, 16  ;;  %s361_s15 = scalar_lea.vmem %s270_s4, 32 }
  0x19   :  { %45 = vperm.xlu0 %319, %v34_v5   ;;  %p358_p8 = scmp.ne.s32.totalorder %s270_s4, %s357_s14  ;;  %p362_p9 = scmp.lt.s32.totalorder %s270_s4, %s270_s4 }
  0x1a   :  { %p363_p10 = scmp.lt.s32.totalorder %s361_s15, %s357_s14 }
  0x1b   :  { %321 = vset.pattern.permute.xlu1 %v390_v10 }
  0x1c   :  { %237 = vperm.xlu1 %321, %v33_v3   ;;  %p364_p11 = por %p363_p10, %p362_p9 }
  0x1d   :  { %322 = vset.pattern.permute.xlu0 %v389_v9 }
  0x1e   :  { %248 = vperm.xlu0 %322, %v33_v3   ;;  %p365_p12 = pnand %p364_p11, %p358_p8 }
  0x94   :  { %v41_v11 = vpop.permute.xlu0 %40 }
  0x96   :  { %v149_v28 = vpop.permute.xlu1 %148 }
  0x97   :  { %v157_v29 = vmul.f32 %v283_v27, %v149_v28 }
  0x98   :  { %v46_v12 = vpop.permute.xlu0 %45 }
  0x9b   :  { %v238_v31 = vpop.permute.xlu1 %237 }
  0x9d   :  { %v249_v38 = vpop.permute.xlu0 %248 }
  0xea   :  { %v297_v13 = vpop.f32.mrb[0].mxu0 }
  0xeb   :  { %v130_v14 = vadd.f32 %v297_v13, %v46_v12  ;;  %v124_v15 = vpop.f32.mrb[1].mxu0 }
  0xec   :  { %v125_v16 = vadd.f32 %v124_v15, %v41_v11 }
  0xed   :  { %v282_v17 = vmul.f32 -1.442695, %v130_v14 }
  0xee   :  { %v281_v18 = vmul.f32 -1.442695, %v125_v16 }
  0xef   :  { %323 = vpow2.f32 %v282_v17 }
  0xf0   :  { %325 = vpow2.f32 %v281_v18 }
  0xf9   :  { %v324_v19 = vpop.eup %323 }
  0xfa   :  { %v326_v20 = vpop.eup %325  ;;  %v140_v21 = vadd.f32 1.0, %v324_v19 }
  0xfb   :  { %v139_v22 = vadd.f32 1.0, %v326_v20 }
  0xfc   :  { %327 = vrcp.f32 %v140_v21 }
  0xfd   :  { %329 = vrcp.f32 %v139_v22 }
 0x106   :  { %v328_v23 = vpop.eup %327 }
 0x107   :  { %v330_v24 = vpop.eup %329 }
 0x108   :  { %v306_v25 = vpack.c.bf16 %v328_v23, %v330_v24 }
 0x10a   :  { %308 = vmatpush3.bf16.msk.msra.mxu1 %vm307_vm4, %v306_v25 }
 0x10d   :  { %303 = vmatmul.mubr.msk.f32.vlgmr.msra.gmra.mrb[0].mxu1 %vm158_vm5, %v146_v26 }
 0x1e0   :  { %v232_v30 = vpop.f32.mrb[0].mxu1 }
 0x1e1   :  { %v233_v32 = vadd.f32 %v232_v30, %v157_v29  ;;  %v304_v33 = vpop.f32.mrb[1].mxu1 }
 0x1e3   :  { %v240_v34 = vadd.f32 %v238_v31, %v233_v32 }
 0x1e5   :  { %v286_v35 = vmul.f32 -1.442695, %v240_v34 }
 0x1e7   :  { %331 = vpow2.f32 %v286_v35 }
 0x1f1   :  { %v332_v36 = vpop.eup %331 }
 0x1f2   :  { %v244_v37 = vadd.f32 1.0, %v332_v36 }
 0x1f4   :  { %333 = vrcp.f32 %v244_v37 }
 0x1fe   :  { %v334_v39 = vpop.eup %333 }
 0x1ff   :  { %v251_v40 = vmul.f32 %v334_v39, %v249_v38 }
 0x201   :  { %v253_v41 = vsel %vm252_vm6, %v251_v40, 0.0 }
 0x202   :  { %v254_v42 = vrot.slane %v253_v41, 4 }
 0x204   :  { %v255_v43 = vadd.f32 %v254_v42, %v253_v41 }
 0x206   :  { %v256_v44 = vrot.slane %v255_v43, 2 }
 0x208   :  { %v257_v45 = vadd.f32 %v256_v44, %v255_v43 }
 0x20a   :  { %v258_v46 = vrot.slane %v257_v45, 1 }
 0x20c   :  { %v259_v47 = vadd.f32 %v258_v46, %v257_v45 }
 0x20e   :  { %v260_v48 = vadd.f32 %v259_v47, %v249_v38 }
 0x210   :  { %262 = vst.msk [vmem:[#allocation5 - $0x5] sm:$0x20] %vm261_vm7, %v260_v48 }
 0x211   :  { %368 = shalt.err (!%p365_p12)
}
 0x212   :  { %s369_s18 = scalar_lea.hbm %s470_s5, 16 }
 0x213   :  { %p370_p13 = scmp.ne.s32.totalorder %s470_s5, %s369_s18  ;;  %p373_p0 = scmp.lt.u32.totalorder %s369_s18, %s470_s5 }
 0x215   :  { %p375_p1 = pnand %p373_p0, %p370_p13 }
 0x217   :  { %378 = shalt.err (!%p375_p1)
}
 0x218   :  { %272 = dma.vmem_to_hbm [thread:$0]  %s270_s4, 16, %s470_s5, [#allocation4]  }
 0x219   :  { %381 = dma.done.wait [#allocation4], 16  }
 0x21a   :  { %382 = vsyncadd [#allocation4], 4294967280 }
 0x21b   :  { %276 = vsyncpa [#allocation3], 1 }
 0x21c   :  { %277 = vsyncpa [#allocation4], 1 }

</bundles_post_ra>
